<compile_context>
chip_gen: v6e
topology: v6e:2x2x1
jax: 0.10.0
libtpu: 0.0.40
codegen_flags: <defaults>
</compile_context>

<pallas_src>
from functools import partial

import jax
import jax.numpy as jnp
from jax.experimental import pallas as pl
from jax.experimental.pallas import tpu as pltpu


def _scale_mul_kernel(s_ref, x_ref, o_ref):
    # s_ref: (tc, 1) f32 per-channel scale tile
    # x_ref: (tc, HW) activation tile in its native dtype
    # o_ref: (tc, HW) output tile (x.dtype by default)
    o_ref[...] = (s_ref[...] * x_ref[...].astype(jnp.float32)).astype(o_ref.dtype)


def _num_tensorcores():
    """TensorCores a single pallas_call can spread a 'parallel' axis over."""
    try:
        dev = jax.devices()[0]
    except Exception:
        return 1
    for attr in ("num_cores", "core_count", "num_cores_per_chip"):
        n = getattr(dev, attr, None)
        if isinstance(n, int) and n > 0:
            return n
    kind = str(getattr(dev, "device_kind", "")).lower()
    # Megacore generations expose 2 TensorCores behind one device.
    for tag in ("v7", "v5p", "v4"):
        if tag in kind:
            return 2
    return 1


def _pick_tc(rows, hw, itemsize, num_cores):
    """Channel tile: dtype-aligned sublanes, >=2 grid steps per TensorCore,
    balanced across cores, fewest steps, least last-block padding, biggest
    tile; double-buffered in+out blocks kept well under scoped VMEM."""
    sub = max(8, 32 // itemsize)        # sublane multiple: 8 f32 / 16 bf16 / 32 i8
    budget = 8 << 20                    # 2x(in) + 2x(out) double-buffered blocks
    min_steps = max(2, 2 * num_cores)   # keep prefetch overlap on every core
    best_t, best_score = None, None
    for t in range(sub, rows + 1, sub):
        if 4 * t * hw * itemsize > budget:
            break                       # t only grows from here
        steps = pl.cdiv(rows, t)
        if steps < min_steps:
            continue
        waste = steps * t - rows        # padded rows in the partial last block
        score = (steps % num_cores != 0,  # balanced split across TensorCores
                 steps,                   # then fewest grid steps
                 waste,                   # then least padding
                 -t)                      # then biggest tile
        if best_score is None or score < best_score:
            best_t, best_score = t, score
    if best_t is not None:
        return best_t
    # Fallback (tiny channel counts): biggest budget-fitting aligned tile,
    # else a single full-extent block (always layout-legal).
    for t in range(rows - rows % sub, 0, -sub):
        if 4 * t * hw * itemsize <= budget:
            return t
    return rows


@partial(jax.jit, static_argnames=("tc", "out_dtype"))
def channel_scale_mul(scale, x, *, tc=None, out_dtype=None):
    """scale: [N, C, 1, 1], x: [N, C, H, W] -> scale * x (broadcast multiply).

    The activation is never promoted: output dtype defaults to x.dtype.
    Pass out_dtype explicitly if PyTorch-style mixed-dtype promotion is
    actually wanted.
    """
    N, C, H, W = x.shape
    assert scale.shape == (N, C, 1, 1)
    rows, hw = N * C, H * W
    out_dtype = x.dtype if out_dtype is None else jnp.dtype(out_dtype)
    x_item = jnp.dtype(x.dtype).itemsize
    out_item = jnp.dtype(out_dtype).itemsize

    x2d = x.reshape(rows, hw)                       # native dtype, no copy under jit
    s2d = scale.reshape(rows, 1).astype(jnp.float32)  # ~1 KB, free

    num_cores = _num_tensorcores()
    sub = max(8, 32 // max(x_item, out_item))
    if tc is None:
        tc = _pick_tc(rows, hw, max(x_item, out_item), num_cores)
    assert tc == rows or tc % sub == 0, (
        f"channel tile {tc} must be a multiple of {sub} (sublanes for this "
        f"dtype) or equal the full channel extent {rows}")
    steps = pl.cdiv(rows, tc)

    cost = pl.CostEstimate(
        flops=rows * hw,
        transcendentals=0,
        bytes_accessed=rows * hw * (x_item + out_item) + rows * 4,
    )

    out2d = pl.pallas_call(
        _scale_mul_kernel,
        out_shape=jax.ShapeDtypeStruct((rows, hw), out_dtype),
        grid_spec=pltpu.PrefetchScalarGridSpec(
            num_scalar_prefetch=0,
            grid=(steps,),
            in_specs=[
                pl.BlockSpec((tc, 1), lambda i: (i, 0)),    # per-tile scale
                pl.BlockSpec((tc, hw), lambda i: (i, 0)),   # activation tile
            ],
            out_specs=pl.BlockSpec((tc, hw), lambda i: (i, 0)),
        ),
        compiler_params=pltpu.CompilerParams(
            dimension_semantics=("parallel",),
        ),
        cost_estimate=cost,
    )(s2d, x2d)

    return out2d.reshape(N, C, H, W)


if __name__ == "__main__":
    key = jax.random.PRNGKey(0)
    k1, k2 = jax.random.split(key)

    # Small-shape primary check (same broadcast-mul semantics as the module).
    xs = jax.random.normal(k1, (2, 4, 16, 16), dtype=jnp.float32)
    ss = jax.random.normal(k2, (2, 4, 1, 1), dtype=jnp.float32)
    outs = jax.block_until_ready(channel_scale_mul(ss, xs))
    assert outs.shape == xs.shape and outs.dtype == xs.dtype
    assert jnp.allclose(outs, ss * xs, atol=1e-6, rtol=1e-6)

    # The module's real shapes (f32) — exercises the multi-step tiled path.
    x108 = jax.random.normal(k1, (1, 240, 56, 56), dtype=jnp.float32)
    x113 = jax.random.normal(k2, (1, 240, 1, 1), dtype=jnp.float32)
    out = jax.block_until_ready(channel_scale_mul(x113, x108))
    ref = x113 * x108
    assert out.shape == (1, 240, 56, 56) and out.dtype == ref.dtype
    assert jnp.allclose(out, ref, atol=1e-6, rtol=1e-6)

    # bf16 activation stays bf16 end-to-end (no wrapper promotion), even with
    # an f32 scale — half the HBM traffic of the promoted path.
    out_bf16 = jax.block_until_ready(
        channel_scale_mul(x113, x108.astype(jnp.bfloat16)))
    assert out_bf16.dtype == jnp.bfloat16
    assert jnp.allclose(out_bf16.astype(jnp.float32), ref, atol=5e-2, rtol=5e-2)

    print("KERNEL_OK")
</pallas_src>

<mosaic_0001>
module attributes {stable_mosaic.version = 11 : i64} {
  func.func @_scale_mul_kernel(%arg0: i32, %arg1: memref<8x1xf32, #tpu.memory_space<vmem>>, %arg2: memref<8x256xf32, #tpu.memory_space<vmem>>, %arg3: memref<8x256xf32, #tpu.memory_space<vmem>>) attributes {dimension_semantics = [#tpu.dimension_semantics<parallel>], iteration_bounds = array<i64: 1>, scalar_prefetch = 0 : i64, scratch_operands = 0 : i64, tpu.core_type = #tpu.core_type<tc>, window_params = [{transform_indices = @transform_0, window_bounds = array<i64: 8, 1>}, {transform_indices = @transform_1, window_bounds = array<i64: 8, 256>}, {transform_indices = @transform_2, window_bounds = array<i64: 8, 256>}]} {
    %c0 = arith.constant 0 : index
    %c0_0 = arith.constant 0 : index
    %0 = vector.load %arg1[%c0, %c0_0] : memref<8x1xf32, #tpu.memory_space<vmem>>, vector<8x1xf32>
    %c0_1 = arith.constant 0 : index
    %c0_2 = arith.constant 0 : index
    %1 = vector.load %arg2[%c0_1, %c0_2] : memref<8x256xf32, #tpu.memory_space<vmem>>, vector<8x256xf32>
    %2 = vector.broadcast %0 : vector<8x1xf32> to vector<8x256xf32>
    %3 = arith.mulf %2, %1 : vector<8x256xf32>
    %c0_3 = arith.constant 0 : index
    %c0_4 = arith.constant 0 : index
    %4 = vector.load %arg3[%c0_3, %c0_4] : memref<8x256xf32, #tpu.memory_space<vmem>>, vector<8x256xf32>
    tpu.vector_store %arg3[%c0_3, %c0_4], %3 {strides = array<i32>} : memref<8x256xf32, #tpu.memory_space<vmem>>, vector<8x256xf32>,
    return
  }
  func.func @transform_0(%arg0: i32) -> (i32, i32) {
    %c0_i32 = arith.constant 0 : i32
    %c0_i32_0 = arith.constant 0 : i32
    return %arg0, %c0_i32 : i32, i32
  }
  func.func @transform_1(%arg0: i32) -> (i32, i32) {
    %c0_i32 = arith.constant 0 : i32
    %c0_i32_0 = arith.constant 0 : i32
    return %arg0, %c0_i32 : i32, i32
  }
  func.func @transform_2(%arg0: i32) -> (i32, i32) {
    %c0_i32 = arith.constant 0 : i32
    %c0_i32_0 = arith.constant 0 : i32
    return %arg0, %c0_i32 : i32, i32
  }
}

</mosaic_0001>

<bundles_post_ra>
// kernel: channel_scale_mul.1
= control target key start
LH: loop header
LB: loop body
LE: loop exit
PB: predicated region body
PF: predicated region fallthrough
CT: control target
= control target key end

     0   :  { %v29_v0 = vmov 0   ;;  %s60_s0 = inlined_call_operand.vmem [shape: f32[8,1], index: 0, kind: input, shape index: {}]   ;;  %s61_s1 = inlined_call_operand.vmem [shape: f32[8,256], index: 1, kind: input, shape index: {}]   ;;  %s62_s2 = inlined_call_operand.vmem [shape: f32[8,256], index: 2, kind: output, shape index: {}]  }
   0x1   :  { %28 = vset.pattern.permute.xlu0 %v29_v0  ;;  %v11_v1 = vld [vmem:[%s60_s0] sm:$0xff]  ;;  %v13_v3 = vld [vmem:[%s61_s1 + $0x8] sm:$0xff] }
   0x2   :  { %16 = vperm.xlu0 %28, %v11_v1   ;;  %v12_v2 = vld [vmem:[%s61_s1] sm:$0xff] }
  0x7d   :  { %v17_v4 = vpop.permute.xlu0 %16 }
  0x7e   :  { %v19_v5 = vmul.f32 %v17_v4, %v12_v2  ;;  %v20_v6 = vmul.f32 %v17_v4, %v13_v3 }
  0x80   :  { %21 = vst [vmem:[%s62_s2] sm:$0xff] %v19_v5  ;;  %22 = vst [vmem:[%s62_s2 + $0x8] sm:$0xff] %v20_v6 }

</bundles_post_ra>
